<compile_context>
chip_gen: v6e
topology: v6e:2x2x1
jax: 0.10.0
libtpu: 0.0.40
codegen_flags: <defaults>
</compile_context>

<pallas_src>
import jax
import jax.numpy as jnp
from jax.experimental import pallas as pl
from jax.experimental.pallas import tpu as pltpu

EPS = 0.5
_MIN_ROWS_FOR_PALLAS = 1024  # below this, per-call overhead dominates -> plain jnp


def _layernorm_kernel(x_ref, w_ref, b_ref, o_ref):
    # Transposed, lane-dense layout:
    #   x_ref / o_ref: (D, TB)  -- D=12 on sublanes, TB (multiple of 128) on lanes
    #   w_ref / b_ref: (D, 1)   -- VMEM-resident, broadcast along lanes
    x = x_ref[...].astype(jnp.float32)  # f32 compute (v5e has no bf16 VPU/EUP)
    inv_d = jnp.float32(1.0 / x.shape[0])

    # Two-pass (centered) statistics: no E[x^2] - mean^2 cancellation.
    mean = jnp.sum(x, axis=0, keepdims=True) * inv_d           # (1, TB) sublane reduce
    xc = x - mean
    var = jnp.sum(xc * xc, axis=0, keepdims=True) * inv_d      # biased variance
    inv = jax.lax.rsqrt(var + jnp.float32(EPS))                # EUP rsqrt

    w = w_ref[...].astype(jnp.float32)                         # (D, 1) lane-broadcast
    b = b_ref[...].astype(jnp.float32)
    o_ref[...] = (xc * inv * w + b).astype(o_ref.dtype)


def _pick_col_tile(B, D):
    """Columns (= LN rows) per grid step, padding-aware and megacore-friendly."""
    padded_d = ((D + 7) // 8) * 8          # sublane padding: 12 -> 16
    bytes_per_col = padded_d * 4           # f32
    budget = 16 << 20                      # pipeline-buffer budget (< 32 MiB scoped)
    # 2 pipeline buffers x (input + output) streams; weight/bias are negligible.
    tb_max = budget // (4 * bytes_per_col)
    tb_max = max(128, (tb_max // 128) * 128)
    # Aim for >= 8 grid steps so both v7x TensorCores get work and DMA pipelines.
    tb_target = pl.cdiv(B, 8)
    tb = min(tb_max, ((tb_target + 127) // 128) * 128)
    return max(128, tb)


def native_layer_norm_4d(x, weight, bias):
    """x: [B, C, H, W]; weight/bias: [C, H, W]; normalize over (C, H, W)."""
    B = x.shape[0]
    D = int(weight.size)

    if B < _MIN_ROWS_FOR_PALLAS:
        # Tiny-batch fast path (covers the spec's [5, 2, 2, 3] shape).
        xf = x.reshape(B, D).astype(jnp.float32)
        mean = jnp.mean(xf, axis=-1, keepdims=True)
        var = jnp.mean((xf - mean) ** 2, axis=-1, keepdims=True)
        y = (xf - mean) * jax.lax.rsqrt(var + jnp.float32(EPS))
        return (y.reshape(x.shape) * weight + bias).astype(x.dtype)

    tb = _pick_col_tile(B, D)
    grid_len = pl.cdiv(B, tb)
    Bp = grid_len * tb

    x2 = x.reshape(B, D)
    if Bp != B:
        # Zero-pad to a whole number of tiles: padded columns produce finite
        # values (var=0, rsqrt(0.5)) and are sliced off below.
        x2 = jnp.pad(x2, ((0, Bp - B), (0, 0)))
    xt = x2.T                               # (D, Bp): lane-dense layout plumbing
    w2 = weight.reshape(D, 1)
    b2 = bias.reshape(D, 1)

    out_t = pl.pallas_call(
        _layernorm_kernel,
        out_shape=jax.ShapeDtypeStruct((D, Bp), x.dtype),
        grid_spec=pltpu.PrefetchScalarGridSpec(
            num_scalar_prefetch=0,
            grid=(grid_len,),
            in_specs=[
                pl.BlockSpec((D, tb), lambda i: (0, i)),   # streamed column tiles
                pl.BlockSpec((D, 1), lambda i: (0, 0)),    # weight: VMEM-resident
                pl.BlockSpec((D, 1), lambda i: (0, 0)),    # bias:   VMEM-resident
            ],
            out_specs=pl.BlockSpec((D, tb), lambda i: (0, i)),
        ),
        compiler_params=pltpu.CompilerParams(
            dimension_semantics=("parallel",),   # spread steps over both TCs on v7x
            vmem_limit_bytes=32 << 20,           # explicit; safe on v5e/v6e/v7x
        ),
    )(xt, w2, b2)

    return out_t.T[:B].reshape(x.shape)


def _reference(x, weight, bias):
    B = x.shape[0]
    xf = x.reshape(B, -1)
    mean = jnp.mean(xf, axis=-1, keepdims=True)
    var = jnp.mean((xf - mean) ** 2, axis=-1, keepdims=True)
    y = (xf - mean) * jax.lax.rsqrt(var + EPS)
    return y.reshape(x.shape) * weight + bias


if __name__ == "__main__":
    key = jax.random.PRNGKey(0)
    kx, kw, kb, kx2 = jax.random.split(key, 4)

    # Spec shape: [5, 2, 2, 3] with weight/bias [2, 2, 3] (tiny-B fast path).
    x = jax.random.normal(kx, (5, 2, 2, 3), dtype=jnp.float32)
    weight = jax.random.normal(kw, (2, 2, 3), dtype=jnp.float32)
    bias = jax.random.normal(kb, (2, 2, 3), dtype=jnp.float32)

    out = jax.block_until_ready(native_layer_norm_4d(x, weight, bias))
    ref = _reference(x, weight, bias)
    assert jnp.allclose(out, ref, atol=1e-5, rtol=1e-5), "mismatch vs reference (B=5)"

    # Large-B input: exercises the Pallas kernel (lane-dense transposed tiles,
    # 8-step grid, resident weight/bias).
    xb = jax.random.normal(kx2, (4096, 2, 2, 3), dtype=jnp.float32)
    outb = jax.block_until_ready(native_layer_norm_4d(xb, weight, bias))
    refb = _reference(xb, weight, bias)
    assert jnp.allclose(outb, refb, atol=1e-5, rtol=1e-5), "mismatch vs reference (B=4096)"

    print("KERNEL_OK")
</pallas_src>

<mosaic_0001>
module attributes {stable_mosaic.version = 11 : i64} {
  func.func @_layernorm_kernel(%arg0: i32, %arg1: memref<12x512xf32, #tpu.memory_space<vmem>>, %arg2: memref<12x1xf32, #tpu.memory_space<vmem>>, %arg3: memref<12x1xf32, #tpu.memory_space<vmem>>, %arg4: memref<12x512xf32, #tpu.memory_space<vmem>>) attributes {dimension_semantics = [#tpu.dimension_semantics<parallel>], iteration_bounds = array<i64: 8>, scalar_prefetch = 0 : i64, scratch_operands = 0 : i64, tpu.core_type = #tpu.core_type<tc>, window_params = [{transform_indices = @transform_0, window_bounds = array<i64: 12, 512>}, {pipeline_mode = #tpu.pipeline_mode<synchronous>, transform_indices = @transform_1, window_bounds = array<i64: 12, 1>}, {pipeline_mode = #tpu.pipeline_mode<synchronous>, transform_indices = @transform_2, window_bounds = array<i64: 12, 1>}, {transform_indices = @transform_3, window_bounds = array<i64: 12, 512>}]} {
    %c0 = arith.constant 0 : index
    %c0_0 = arith.constant 0 : index
    %0 = vector.load %arg1[%c0, %c0_0] : memref<12x512xf32, #tpu.memory_space<vmem>>, vector<12x512xf32>
    %cst = arith.constant dense<0.000000e+00> : vector<512xf32>
    %1 = vector.multi_reduction <add>, %0, %cst [0] : vector<12x512xf32> to vector<512xf32>
    %2 = vector.shape_cast %1 : vector<512xf32> to vector<1x512xf32>
    %cst_1 = arith.constant 0.0833333358 : f32
    %3 = vector.broadcast %cst_1 : f32 to vector<1x512xf32>
    %4 = arith.mulf %2, %3 : vector<1x512xf32>
    %5 = vector.broadcast %4 : vector<1x512xf32> to vector<12x512xf32>
    %6 = arith.subf %0, %5 : vector<12x512xf32>
    %7 = arith.mulf %6, %6 : vector<12x512xf32>
    %cst_2 = arith.constant dense<0.000000e+00> : vector<512xf32>
    %8 = vector.multi_reduction <add>, %7, %cst_2 [0] : vector<12x512xf32> to vector<512xf32>
    %9 = vector.shape_cast %8 : vector<512xf32> to vector<1x512xf32>
    %cst_3 = arith.constant 0.0833333358 : f32
    %10 = vector.broadcast %cst_3 : f32 to vector<1x512xf32>
    %11 = arith.mulf %9, %10 : vector<1x512xf32>
    %cst_4 = arith.constant 5.000000e-01 : f32
    %12 = vector.broadcast %cst_4 : f32 to vector<1x512xf32>
    %13 = arith.addf %11, %12 : vector<1x512xf32>
    %14 = math.rsqrt %13 : vector<1x512xf32>
    %c0_5 = arith.constant 0 : index
    %c0_6 = arith.constant 0 : index
    %15 = vector.load %arg2[%c0_5, %c0_6] : memref<12x1xf32, #tpu.memory_space<vmem>>, vector<12x1xf32>
    %c0_7 = arith.constant 0 : index
    %c0_8 = arith.constant 0 : index
    %16 = vector.load %arg3[%c0_7, %c0_8] : memref<12x1xf32, #tpu.memory_space<vmem>>, vector<12x1xf32>
    %17 = vector.broadcast %14 : vector<1x512xf32> to vector<12x512xf32>
    %18 = arith.mulf %6, %17 : vector<12x512xf32>
    %19 = vector.broadcast %15 : vector<12x1xf32> to vector<12x512xf32>
    %20 = arith.mulf %18, %19 : vector<12x512xf32>
    %21 = vector.broadcast %16 : vector<12x1xf32> to vector<12x512xf32>
    %22 = arith.addf %20, %21 : vector<12x512xf32>
    %c0_9 = arith.constant 0 : index
    %c0_10 = arith.constant 0 : index
    %23 = vector.load %arg4[%c0_9, %c0_10] : memref<12x512xf32, #tpu.memory_space<vmem>>, vector<12x512xf32>
    tpu.vector_store %arg4[%c0_9, %c0_10], %22 {strides = array<i32>} : memref<12x512xf32, #tpu.memory_space<vmem>>, vector<12x512xf32>,
    return
  }
  func.func @transform_0(%arg0: i32) -> (i32, i32) {
    %c0_i32 = arith.constant 0 : i32
    %c0_i32_0 = arith.constant 0 : i32
    return %c0_i32, %arg0 : i32, i32
  }
  func.func @transform_1(%arg0: i32) -> (i32, i32) {
    %c0_i32 = arith.constant 0 : i32
    %c0_i32_0 = arith.constant 0 : i32
    %c0_i32_1 = arith.constant 0 : i32
    return %c0_i32, %c0_i32_0 : i32, i32
  }
  func.func @transform_2(%arg0: i32) -> (i32, i32) {
    %c0_i32 = arith.constant 0 : i32
    %c0_i32_0 = arith.constant 0 : i32
    %c0_i32_1 = arith.constant 0 : i32
    return %c0_i32, %c0_i32_0 : i32, i32
  }
  func.func @transform_3(%arg0: i32) -> (i32, i32) {
    %c0_i32 = arith.constant 0 : i32
    %c0_i32_0 = arith.constant 0 : i32
    return %c0_i32, %arg0 : i32, i32
  }
}

</mosaic_0001>

<bundles_post_ra>
// kernel: tpu_custom_call.1
= control target key start
LH: loop header
LB: loop body
LE: loop exit
PB: predicated region body
PF: predicated region fallthrough
CT: control target
= control target key end

     0   :  { %8 = vsyncpa [#allocation3], 0  ;;  %s839_s0 = inlined_call_operand.hbm [shape: f32[12,4096], index: 0, kind: input, shape index: {}]   ;;  %s840_s1 = inlined_call_operand.vmem [shape: f32[12,1], index: 1, kind: input, shape index: {}]   ;;  %s841_s2 = inlined_call_operand.vmem [shape: f32[12,1], index: 2, kind: input, shape index: {}]   ;;  %s842_s3 = inlined_call_operand.hbm [shape: f32[12,4096], index: 3, kind: output, shape index: {}]  }
   0x1   :  { %10 = vsyncpa [#allocation3 + $0x1], 0 }
   0x2   :  { %11 = vsyncpa [#allocation4], 0 }
   0x3   :  { %13 = vsyncpa [#allocation4 + $0x1], 0  ;;  %s641_s12 = smov 0   ;;  %s643_s13 = smov 0  }
   0x4   :  { %s645_s14 = smov 0   ;;  %s647_s15 = smov 0  }
   0x5 LB: > { %s662_s16 = sadd.s32 4294967295, %s610_s15   ;;  %s439_s17 = sadd.s32 4294967294, %s610_s15   ;;  %s610_s15 = sphi %s647_s15, %s857_s15   ;;  %s606_s14 = sphi %s645_s14, %s856_s14   ;;  %s602_s13 = sphi %s643_s13, %s855_s13   ;;  %s598_s12 = sphi %s641_s12, %s854_s12  }
   0x6   : > { %s666_s18 = sadd.s32 1, %s610_s15   ;;  %s26_s19 = sadd.s32 1, %s606_s14 }
   0x7   : > { %s23_s20 = ssub.s32 %s610_s15, %s666_s18  ;;  %p33_p0 = scmp.ne.s32.totalorder %s606_s14, %s602_s13 }
   0x8   : > { %p24_p1 = scmp.eq.s32.totalorder %s23_s20, 0  ;;  %p34_p2 = scmp.eq.s32.totalorder %s610_s15, 0 }
   0x9   : > { %p39_p3 = scmp.ne.s32.totalorder %s602_s13, %s598_s12  ;;  %p40_p4 = scmp.eq.s32.totalorder %s662_s16, 0 }
   0xa   : > { %s678_s21 = scalar_select %p24_p1, %s606_s14, %s26_s19  }
   0xb   : > { %p680_p5 = por %p34_p2, %p33_p0  ;;  %p684_p6 = por %p40_p4, %p39_p3 }
   0xc   : > { %p105_p7 = scmp.eq.s32.totalorder %s662_s16, 7  ;;  %p111_p8 = scmp.eq.s32.totalorder %s439_s17, 7 }
   0xd   : > { %s846_s23 = scalar_select %p684_p6, 1, 0 }
   0xe   : > { %p467_p9 = scmp.lt.s32.totalorder %s610_s15, 8  ;;  %p690_p10 = por %p105_p7, %p33_p0 }
   0xf   : > { %p694_p11 = por %p111_p8, %p39_p3  ;;  %s137_s26 = sand.u32 1, %s606_s14  }
  0x10   : > { %s847_s24 = scalar_select %p690_p10, 1, 0 }
  0x11   : > { %s848_s25 = scalar_select %p694_p11, 1, 0 }
  0x12   : > { %s453_s27 = sshll.u32 %s610_s15, 9  ;;  %s442_s28 = sshll.u32 %s137_s26, 6 }
  0x13   : > { %s703_s4 = scalar_lea.hbm %s839_s0, %s453_s27  ;;  %s141_s5 = scalar_lea.vmem [#allocation2], %s442_s28 }
  0x14   : > { %s148_s6 = sshll.u32 %s141_s5, 4  ;;  %p707_p12 = pnand %p467_p9, %p680_p5  ;;  %s711_s6 = int_to_ptr.vmem [resolvable:$true] %s148_s6 }
  0x15   : > { %s714_s8 = scalar_lea.sflag [#allocation3], %s137_s26  ;;  %s518_s9 = scalar_lea.hbm %s703_s4, 1024 }
  0x16   : > { %p519_p0 = scmp.ne.s32.totalorder %s703_s4, %s518_s9  ;;  %p520_p1 = pneg %p707_p12 }
  0x17   : > { %s523_s17 = scalar_lea.hbm %s839_s0, 8192  ;;  %p524_p4 = scmp.lt.s32.totalorder %s703_s4, %s839_s0 }
  0x18   : > { %p521_p2 = pnand %p520_p1, %p519_p0  ;;  %p525_p5 = scmp.lt.s32.totalorder %s523_s17, %s518_s9 }
  0x1a   : > { %p522_p3 = pneg %p521_p2  ;;  %p526_p7 = por %p525_p5, %p524_p4 }
  0x1c   : > { %p527_p8 = pnand %p526_p7, %p522_p3 }
  0x1e   : > { %530 = shalt.err (!%p527_p8)
}
  0x1f   : > { %s531_s22 = scalar_lea.vmem %s711_s6, 1024  ;;  %s612_s26 = smov [#allocation2]  }
  0x20   : > { %p532_p9 = scmp.ne.s32.totalorder %s711_s6, %s531_s22  ;;  %s536_s27 = sshll.u32 %s612_s26, 4  ;;  %s537_s27 = int_to_ptr.vmem [resolvable:$false] %s536_s27 }
  0x21   : > { %s538_s28 = scalar_lea.vmem %s537_s27, 2048  ;;  %p539_p2 = scmp.lt.s32.totalorder %s711_s6, %s537_s27 }
  0x22   : > { %p534_p13 = pnand %p532_p9, %p520_p1  ;;  %p540_p11 = scmp.lt.s32.totalorder %s538_s28, %s531_s22 }
  0x24   : > { %p535_p0 = pneg %p534_p13  ;;  %p541_p10 = por %p540_p11, %p539_p2 }
  0x26   : > { %p542_p6 = pnand %p541_p10, %p535_p0 }
  0x28   : > { %545 = shalt.err (!%p542_p6)
}
  0x29   : > { %s613_s29 = smov 4096   ;;  %s614_s30 = smov 512  }
  0x2a   : > { %s615_s5 = smov 32   ;;  %p156_p13 = scmp.lt.s32.totalorder %s610_s15, 9 }
  0x2b   : > { %462 = dma.hbm_to_vmem [thread:$0]  (!%p707_p12), %s703_s4, 1024, %s711_s6, %s714_s8, %s613_s29, %s614_s30, %s615_s5  }
  0x2c   : > { %p850_p1 = scmp.ge.s32.totalorder %s610_s15, 1 }
  0x2e   : > { %p157_p3 = pnand %p850_p1, %p156_p13 }
  0x2f   : > { %s739_s9 = sand.u32 (!%p157_p3), 1, %s602_s13   ;;  %p851_p6 = scmp.ne.s32.totalorder (!%p157_p3), %s846_s23, 0 }
  0x30   : > { %160 = sbr.rel (%p157_p3) target bundleno = 204 (0xcc), region = 32  ;;  %s446_s10 = sshll.u32 (!%p157_p3), %s739_s9, 6 }
  0x31   : > { %s163_s11 = scalar_lea.sflag (!%p157_p3), [#allocation3], %s739_s9  ;;  %s166_s17 = scalar_lea.vmem (!%p157_p3), [#allocation2], %s446_s10 }
  0x35   : > { %589 = dma.done.wait (%p851_p6), %s163_s11, 1024  }
  0x36   : > { %591 = vsyncadd (%p851_p6), %s163_s11, 4294966272  ;;  %v616_v0 = vmov 0   ;;  %v298_v1 = vld [vmem:[%s841_s2] sm:$0xff]  ;;  %v299_v3 = vld [vmem:[%s841_s2 + $0x8] sm:$0xf]  ;;  %vm199_vm0 = vcmask 1043456  }
  0x37   : > { %509 = vset.pattern.permute.xlu1 %v616_v0  ;;  %508 = vset.pattern.permute.xlu0 %v616_v0  ;;  %v296_v2 = vld [vmem:[%s840_s1] sm:$0xff]  ;;  %v297_v4 = vld [vmem:[%s840_s1 + $0x8] sm:$0xf]  ;;  %v197_v7 = vld [vmem:[%s166_s17 + $0x30] sm:$0xf]  ;;  %s188_s26 = scalar_lea.vmem [#allocation5], %s446_s10 }
  0x38   : > { %328 = vperm.xlu1 %509, %v298_v1   ;;  %310 = vperm.xlu0 %508, %v296_v2   ;;  %v195_v5 = vld [vmem:[%s166_s17 + $0x20] sm:$0xf]  ;;  %v196_v6 = vld [vmem:[%s166_s17 + $0x28] sm:$0xf]  ;;  %v198_v9 = vld [vmem:[%s166_s17 + $0x38] sm:$0xf] }
  0x39   : > { %v191_v8 = vld [vmem:[%s166_s17] sm:$0xff]  ;;  %v200_v10 = vsel %vm199_vm0, %v195_v5, 0.0  ;;  %v192_v11 = vld [vmem:[%s166_s17 + $0x8] sm:$0xff]  ;;  %v208_v12 = vsel %vm199_vm0, %v196_v6, 0.0  ;;  %v193_v13 = vld [vmem:[%s166_s17 + $0x10] sm:$0xff]  ;;  %v216_v14 = vsel %vm199_vm0, %v197_v7, 0.0 }
  0x3a   : > { %v194_v15 = vld [vmem:[%s166_s17 + $0x18] sm:$0xff]  ;;  %v201_v16 = vadd.f32 %v200_v10, %v191_v8  ;;  %v224_v17 = vsel %vm199_vm0, %v198_v9, 0.0  ;;  %v209_v18 = vadd.f32 %v208_v12, %v192_v11  ;;  %v217_v19 = vadd.f32 %v216_v14, %v193_v13  ;;  %s366_s27 = sshll.u32 %s188_s26, 4  ;;  %s454_s28 = sshll.u32 %s662_s16, 9  ;;  %s792_s27 = int_to_ptr.vmem [resolvable:$true] %s366_s27 }
  0x3b   : > { %v225_v20 = vadd.f32 %v224_v17, %v194_v15  ;;  %s797_s16 = scalar_lea.hbm %s842_s3, %s454_s28  ;;  %s353_s5 = scalar_lea.sflag [#allocation4], %s739_s9 }
  0x3c   : > { %333 = vperm.xlu1 %509, %v299_v3   ;;  %315 = vperm.xlu0 %508, %v297_v4   ;;  %v202_v21 = vrot.slane %v201_v16, 4  ;;  %v210_v22 = vrot.slane %v209_v18, 4  ;;  %v218_v23 = vrot.slane %v217_v19, 4  ;;  %s546_s10 = scalar_lea.vmem %s792_s27, 1024  ;;  %p852_p11 = scmp.ne.s32.totalorder %s847_s24, 0 }
  0x3d   : > { %v226_v24 = vrot.slane %v225_v20, 4  ;;  %p547_p10 = scmp.ne.s32.totalorder %s792_s27, %s546_s10  ;;  %s617_s11 = smov [#allocation5]  }
  0x3e   : > { %v203_v25 = vadd.f32 %v202_v21, %v201_v16  ;;  %v211_v26 = vadd.f32 %v210_v22, %v209_v18  ;;  %v219_v27 = vadd.f32 %v218_v23, %v217_v19  ;;  %s550_s17 = sshll.u32 %s617_s11, 4  ;;  %s551_s17 = int_to_ptr.vmem [resolvable:$false] %s550_s17 }
  0x3f   : > { %v227_v28 = vadd.f32 %v226_v24, %v225_v20  ;;  %p548_p12 = pnand %p547_p10, %p852_p11  ;;  %s552_s4 = scalar_lea.vmem %s551_s17, 2048 }
  0x40   : > { %v204_v29 = vrot.slane %v203_v25, 2  ;;  %v212_v30 = vrot.slane %v211_v26, 2  ;;  %v220_v31 = vrot.slane %v219_v27, 2  ;;  %p553_p5 = scmp.lt.s32.totalorder %s792_s27, %s551_s17  ;;  %p554_p7 = scmp.lt.s32.totalorder %s552_s4, %s546_s10 }
  0x41   : > { %v228_v32 = vrot.slane %v227_v28, 2  ;;  %p549_p4 = pneg %p548_p12 }
  0x42   : > { %v205_v33 = vadd.f32 %v204_v29, %v203_v25  ;;  %v213_v34 = vadd.f32 %v212_v30, %v211_v26  ;;  %v221_v35 = vadd.f32 %v220_v31, %v219_v27  ;;  %p555_p8 = por %p554_p7, %p553_p5 }
  0x43   : > { %v229_v36 = vadd.f32 %v228_v32, %v227_v28 }
  0x44   : > { %v206_v37 = vrot.slane %v205_v33, 1  ;;  %v214_v38 = vrot.slane %v213_v34, 1  ;;  %v222_v39 = vrot.slane %v221_v35, 1  ;;  %p556_p9 = pnand %p555_p8, %p549_p4 }
  0x45   : > { %v230_v40 = vrot.slane %v229_v36, 1 }
  0x46   : > { %v207_v41 = vadd.f32 %v206_v37, %v205_v33  ;;  %v215_v42 = vadd.f32 %v214_v38, %v213_v34  ;;  %v223_v43 = vadd.f32 %v222_v39, %v221_v35 }
  0x47   : > { %v231_v44 = vadd.f32 %v230_v40, %v229_v36 }
  0x48   : > { %v232_v45 = vmul.f32 0.083333336, %v207_v41  ;;  %v233_v46 = vmul.f32 0.083333336, %v215_v42  ;;  %v234_v47 = vmul.f32 0.083333336, %v223_v43 }
  0x49   : > { %v235_v48 = vmul.f32 0.083333336, %v231_v44 }
  0x4a   : > { %v765_v49 = vsub.f32 %v195_v5, %v232_v45  ;;  %v767_v50 = vsub.f32 %v196_v6, %v233_v46  ;;  %v769_v51 = vsub.f32 %v197_v7, %v234_v47  ;;  %v236_v52 = vsub.f32 %v191_v8, %v232_v45 }
  0x4b   : > { %v771_v53 = vsub.f32 %v198_v9, %v235_v48  ;;  %v237_v54 = vsub.f32 %v192_v11, %v233_v46  ;;  %v238_v56 = vsub.f32 %v193_v13, %v234_v47  ;;  %v239_v58 = vsub.f32 %v194_v15, %v235_v48 }
  0x4c   : > { %v248_v55 = vmul.f32 %v765_v49, %v765_v49  ;;  %v249_v57 = vmul.f32 %v767_v50, %v767_v50  ;;  %v250_v59 = vmul.f32 %v769_v51, %v769_v51  ;;  %v244_v60 = vmul.f32 %v236_v52, %v236_v52 }
  0x4d   : > { %v251_v61 = vmul.f32 %v771_v53, %v771_v53  ;;  %v245_v62 = vmul.f32 %v237_v54, %v237_v54  ;;  %v246_v0 = vmul.f32 %v238_v56, %v238_v56  ;;  %v247_v2 = vmul.f32 %v239_v58, %v239_v58 }
  0x4e   : > { %v252_v63 = vsel %vm199_vm0, %v248_v55, 0.0  ;;  %v260_v1 = vsel %vm199_vm0, %v249_v57, 0.0  ;;  %v268_v3 = vsel %vm199_vm0, %v250_v59, 0.0 }
  0x4f   : > { %v253_v4 = vadd.f32 %v252_v63, %v244_v60  ;;  %v276_v5 = vsel %vm199_vm0, %v251_v61, 0.0  ;;  %v261_v6 = vadd.f32 %v260_v1, %v245_v62  ;;  %v269_v7 = vadd.f32 %v268_v3, %v246_v0 }
  0x50   : > { %v277_v8 = vadd.f32 %v276_v5, %v247_v2 }
  0x51   : > { %v254_v9 = vrot.slane %v253_v4, 4  ;;  %v262_v10 = vrot.slane %v261_v6, 4  ;;  %v270_v11 = vrot.slane %v269_v7, 4 }
  0x52   : > { %v278_v12 = vrot.slane %v277_v8, 4 }
  0x53   : > { %v255_v13 = vadd.f32 %v254_v9, %v253_v4  ;;  %v263_v14 = vadd.f32 %v262_v10, %v261_v6  ;;  %v271_v15 = vadd.f32 %v270_v11, %v269_v7 }
  0x54   : > { %v279_v16 = vadd.f32 %v278_v12, %v277_v8 }
  0x55   : > { %v256_v17 = vrot.slane %v255_v13, 2  ;;  %v264_v18 = vrot.slane %v263_v14, 2  ;;  %v272_v19 = vrot.slane %v271_v15, 2 }
  0x56   : > { %v280_v20 = vrot.slane %v279_v16, 2 }
  0x57   : > { %v257_v21 = vadd.f32 %v256_v17, %v255_v13  ;;  %v265_v22 = vadd.f32 %v264_v18, %v263_v14  ;;  %v273_v23 = vadd.f32 %v272_v19, %v271_v15 }
  0x58   : > { %v281_v24 = vadd.f32 %v280_v20, %v279_v16 }
  0x59   : > { %v258_v25 = vrot.slane %v257_v21, 1  ;;  %v266_v26 = vrot.slane %v265_v22, 1  ;;  %v274_v27 = vrot.slane %v273_v23, 1 }
  0x5a   : > { %v282_v28 = vrot.slane %v281_v24, 1 }
  0x5b   : > { %v259_v29 = vadd.f32 %v258_v25, %v257_v21  ;;  %v267_v30 = vadd.f32 %v266_v26, %v265_v22  ;;  %v275_v31 = vadd.f32 %v274_v27, %v273_v23 }
  0x5c   : > { %v283_v32 = vadd.f32 %v282_v28, %v281_v24 }
  0x5d   : > { %v284_v33 = vmul.f32 0.083333336, %v259_v29  ;;  %v285_v34 = vmul.f32 0.083333336, %v267_v30  ;;  %v286_v35 = vmul.f32 0.083333336, %v275_v31 }
  0x5e   : > { %v287_v36 = vmul.f32 0.083333336, %v283_v32 }
  0x5f   : > { %v288_v37 = vadd.f32 0.5, %v284_v33  ;;  %v289_v38 = vadd.f32 0.5, %v285_v34  ;;  %v290_v39 = vadd.f32 0.5, %v286_v35 }
  0x60   : > { %v291_v40 = vadd.f32 0.5, %v287_v36 }
  0x61   : > { %510 = vrsqrt.f32 %v288_v37 }
  0x62   : > { %512 = vrsqrt.f32 %v289_v38 }
  0x63   : > { %514 = vrsqrt.f32 %v290_v39 }
  0x64   : > { %516 = vrsqrt.f32 %v291_v40 }
  0x6e   : > { %v511_v41 = vpop.eup %510 }
  0x6f   : > { %v513_v42 = vpop.eup %512  ;;  %v300_v45 = vmul.f32 %v511_v41, %v236_v52  ;;  %v304_v59 = vmul.f32 %v511_v41, %v765_v49 }
  0x70   : > { %v515_v43 = vpop.eup %514  ;;  %v301_v46 = vmul.f32 %v513_v42, %v237_v54  ;;  %v305_v60 = vmul.f32 %v513_v42, %v767_v50 }
  0x71   : > { %v517_v44 = vpop.eup %516  ;;  %v302_v47 = vmul.f32 %v515_v43, %v238_v56  ;;  %v306_v61 = vmul.f32 %v515_v43, %v769_v51 }
  0x72   : > { %v303_v48 = vmul.f32 %v517_v44, %v239_v58  ;;  %v307_v62 = vmul.f32 %v517_v44, %v771_v53 }
  0xb3   : > { %v329_v55 = vpop.permute.xlu1 %328  ;;  %v311_v57 = vpop.permute.xlu0 %310 }
  0xb4   : > { %v318_v63 = vmul.f32 %v311_v57, %v300_v45  ;;  %v319_v0 = vmul.f32 %v311_v57, %v301_v46  ;;  %v320_v1 = vmul.f32 %v311_v57, %v302_v47  ;;  %v321_v2 = vmul.f32 %v311_v57, %v303_v48 }
  0xb6   : > { %v336_v52 = vadd.f32 %v329_v55, %v318_v63  ;;  %v337_v54 = vadd.f32 %v329_v55, %v319_v0  ;;  %v338_v56 = vadd.f32 %v329_v55, %v320_v1  ;;  %v339_v58 = vadd.f32 %v329_v55, %v321_v2 }
  0xb7   : > { %v316_v3 = vpop.permute.xlu0 %315  ;;  %v334_v4 = vpop.permute.xlu1 %333 }
  0xb8   : > { %344 = vst [vmem:[%s188_s26] sm:$0xff] %v336_v52  ;;  %345 = vst [vmem:[%s188_s26 + $0x8] sm:$0xff] %v337_v54  ;;  %v322_v49 = vmul.f32 %v316_v3, %v304_v59  ;;  %v323_v50 = vmul.f32 %v316_v3, %v305_v60  ;;  %v324_v51 = vmul.f32 %v316_v3, %v306_v61 }
  0xb9   : > { %346 = vst [vmem:[%s188_s26 + $0x10] sm:$0xff] %v338_v56  ;;  %347 = vst [vmem:[%s188_s26 + $0x18] sm:$0xff] %v339_v58  ;;  %v325_v53 = vmul.f32 %v316_v3, %v307_v62 }
  0xba   : > { %v340_v5 = vadd.f32 %v334_v4, %v322_v49  ;;  %v341_v6 = vadd.f32 %v334_v4, %v323_v50  ;;  %v342_v7 = vadd.f32 %v334_v4, %v324_v51 }
  0xbb   : > { %v343_v8 = vadd.f32 %v334_v4, %v325_v53 }
  0xbc   : > { %348 = vst [vmem:[%s188_s26 + $0x20] sm:$0xf] %v340_v5  ;;  %349 = vst [vmem:[%s188_s26 + $0x28] sm:$0xf] %v341_v6 }
  0xbd   : > { %350 = vst [vmem:[%s188_s26 + $0x30] sm:$0xf] %v342_v7  ;;  %351 = vst [vmem:[%s188_s26 + $0x38] sm:$0xf] %v343_v8 }
  0xbe   : > { %559 = shalt.err (!%p556_p9)
}
  0xbf   : > { %s560_s6 = scalar_lea.hbm %s797_s16, 1024  ;;  %s564_s19 = scalar_lea.hbm %s842_s3, 8192 }
  0xc0   : > { %p561_p0 = scmp.ne.s32.totalorder %s797_s16, %s560_s6  ;;  %p565_p1 = scmp.lt.s32.totalorder %s797_s16, %s842_s3 }
  0xc1   : > { %p566_p3 = scmp.lt.s32.totalorder %s564_s19, %s560_s6 }
  0xc2   : > { %p562_p2 = pnand %p561_p0, %p852_p11 }
  0xc3   : > { %p567_p6 = por %p566_p3, %p565_p1 }
  0xc4   : > { %p563_p13 = pneg %p562_p2 }
  0xc6   : > { %p568_p10 = pnand %p567_p6, %p563_p13 }
  0xc8   : > { %571 = shalt.err (!%p568_p10)
}
  0xc9   : > { %s618_s23 = smov 512   ;;  %s619_s26 = smov 4096  }
  0xca   : > { %s620_s28 = smov 32  }
  0xcb   : > { %457 = dma.vmem_to_hbm [thread:$0]  (%p852_p11), %s792_s27, 1024, %s797_s16, %s353_s5, %s618_s23, %s619_s26, %s620_s28  }
  0xcc PF: > { %p468_p12 = scmp.ge.s32.totalorder %s610_s15, 2  ;;  %s381_s29 = sand.u32 1, %s598_s12  }
  0xcd   : > { %p853_p4 = scmp.ne.s32.totalorder %s848_s25, 0  ;;  %s382_s30 = scalar_lea.sflag [#allocation4], %s381_s29 }
  0xcf   : > { %p464_p5 = pnand %p468_p12, %p853_p4 }
  0xd1   : > { %p465_p7 = pneg %p464_p5 }
  0xd3   : > { %593 = dma.done.wait (%p465_p7), %s382_s30, 1024  }
  0xd4   : > { %595 = vsyncadd (%p465_p7), %s382_s30, 4294966272  ;;  %p16_p8 = scmp.ge.s32.totalorder %s666_s18, 10   ;;  %s854_s12 = smov %s602_s13 }
  0xd5   : > { %s855_s13 = smov %s606_s14  ;;  %s856_s14 = smov %s678_s21 }
  0xd6   : > { %s857_s15 = smov %s666_s18  ;;  %18 = sbr.rel (!%p16_p8) target bundleno = 5 (0x5), region = 77 }
  0xdb   :  { %387 = vsyncpa [#allocation3], 1 }
  0xdc   :  { %389 = vsyncpa [#allocation3 + $0x1], 1 }
  0xdd   :  { %390 = vsyncpa [#allocation4], 1 }
  0xde   :  { %392 = vsyncpa [#allocation4 + $0x1], 1 }

</bundles_post_ra>
